<compile_context>
chip_gen: v7x
topology: tpu7x:2x2x1
jax: 0.10.0
libtpu: 0.0.40
codegen_flags: <defaults>
</compile_context>

<pallas_src>
import functools
import math

import jax
import jax.numpy as jnp
from jax.experimental import pallas as pl
from jax.experimental.pallas import tpu as pltpu

HIDDEN = 128
LANE = 128
SUBLANE = 8
N_LAYERS = 5


def _round_up(n, m):
    return ((n + m - 1) // m) * m


# --------------------------------------------------------------------------
# Kernel
# --------------------------------------------------------------------------
def _mlp_kernel(midx_ref, x_ref, w_ref, b_ref, o_ref):
    """Fused 5-layer MLP for one selected model (grid axis = selection index).

    midx_ref : SMEM (n_sel,) int32     scalar-prefetched model ids (used only
                                       by the index_maps)
    x_ref    : VMEM (B_pad, 128) f32   lane-padded input (same block every step)
    w_ref    : VMEM (5, 128, 128) bf16 all weight matrices of the selected model
    b_ref    : VMEM (8, 128) f32       rows 0..4 = biases, rows 5..7 = zero
    o_ref    : VMEM (B_pad, 128) f32   lane-dense output; cols >= out_dim and
                                       rows >= batch are padding, sliced off in
                                       the wrapper.

    Activations stay f32 (bias add / ReLU); they are cast to bf16 only as MXU
    operands with f32 accumulation.  NOTE: padded batch rows carry ReLU(bias)
    values internally -- harmless because the wrapper slices them off, but do
    NOT add any in-kernel reduction over the batch axis.
    """
    del midx_ref  # consumed by the index_maps only
    h = x_ref[...]                       # (B_pad, 128) f32
    b_all = b_ref[...]                   # (8, 128) f32 -- one vreg
    for l in range(N_LAYERS):            # static unroll: 5 back-to-back matmuls
        w = w_ref[l]                     # (128, 128) bf16
        h = jnp.dot(h.astype(jnp.bfloat16), w,
                    preferred_element_type=jnp.float32) + b_all[l:l + 1, :]
        if l < N_LAYERS - 1:
            h = jnp.maximum(h, 0.0)
    o_ref[...] = h.astype(o_ref.dtype)   # lane-dense (B_pad, 128) store


def _fused_pallas(x, midx, w_all, b_all):
    """x:(B_pad,128) f32, midx:(n_sel,) i32, w_all:(2,5,128,128) bf16,
    b_all:(2,8,128) f32  ->  (n_sel, B_pad, 128) f32."""
    n_sel = midx.shape[0]
    b_pad, in_pad = x.shape

    grid_spec = pltpu.PrefetchScalarGridSpec(
        num_scalar_prefetch=1,
        grid=(n_sel,),
        in_specs=[
            # Same block index every grid step -> fetched once, stays resident.
            pl.BlockSpec((b_pad, in_pad), lambda i, midx: (0, 0)),
            # One DMA per grid step brings ALL 5 weight matrices (160 KiB bf16)
            # of the model selected by the scalar-prefetched index.
            pl.BlockSpec((None, N_LAYERS, HIDDEN, HIDDEN),
                         lambda i, midx: (midx[i], 0, 0, 0)),
            # All 5 biases in a single (8,128) block -> one 4 KiB DMA.
            pl.BlockSpec((None, SUBLANE, HIDDEN),
                         lambda i, midx: (midx[i], 0, 0)),
        ],
        out_specs=pl.BlockSpec((None, b_pad, LANE), lambda i, midx: (i, 0, 0)),
    )
    return pl.pallas_call(
        _mlp_kernel,
        grid_spec=grid_spec,
        out_shape=jax.ShapeDtypeStruct((n_sel, b_pad, LANE), jnp.float32),
        compiler_params=pltpu.CompilerParams(
            dimension_semantics=("parallel",)),
    )(midx, x, w_all, b_all)


@functools.partial(jax.jit, static_argnames=("out_dim",))
def _forward(x, midx, w_all, b_all, out_dim):
    """Pad (batch -> x8 sublanes, features -> 128 lanes), run the fused kernel
    for the selected model indices, strip the padding."""
    batch, in_dim = x.shape
    in_pad = w_all.shape[-2]                      # 128
    b_pad = max(SUBLANE, _round_up(batch, SUBLANE))
    x_p = jnp.pad(x, ((0, b_pad - batch), (0, in_pad - in_dim)))
    out = _fused_pallas(x_p, midx, w_all, b_all)  # (n_sel, B_pad, 128)
    return out[:, :batch, :out_dim]


# --------------------------------------------------------------------------
# Module wrapper
# --------------------------------------------------------------------------
def _init_linear(key, fan_in, fan_out):
    """PyTorch nn.Linear default init (uniform, bound = 1/sqrt(fan_in)).
    Weight stored transposed as (fan_in, fan_out) so the kernel computes
    x @ W (== x @ W_pt.T)."""
    kw, kb = jax.random.split(key)
    bound = 1.0 / math.sqrt(fan_in)
    w = jax.random.uniform(kw, (fan_in, fan_out), jnp.float32, -bound, bound)
    b = jax.random.uniform(kb, (fan_out,), jnp.float32, -bound, bound)
    return w, b


def _pack_model(layers):
    """Pack 5 (w, b) f32 layers into (5,128,128) bf16 weights + (8,128) f32
    biases, zero-padded to square/lane-dense tiles."""
    w_pack = jnp.zeros((N_LAYERS, HIDDEN, HIDDEN), jnp.bfloat16)
    b_pack = jnp.zeros((SUBLANE, HIDDEN), jnp.float32)
    for l, (w, b) in enumerate(layers):
        w_pack = w_pack.at[l, :w.shape[0], :w.shape[1]].set(w.astype(jnp.bfloat16))
        b_pack = b_pack.at[l, :b.shape[0]].set(b)
    return w_pack, b_pack


class NetPallas:
    """JAX/Pallas equivalent of the PyTorch Net module (online + target MLPs)."""

    def __init__(self, input_dim, output_dim, key):
        if input_dim > HIDDEN or output_dim > HIDDEN:
            # TODO(synk): support >128 in/out dims with non-square edge layers.
            raise ValueError("NetPallas currently requires input_dim, "
                             "output_dim <= 128")
        dims = [input_dim, HIDDEN, HIDDEN, HIDDEN, HIDDEN, output_dim]
        keys = jax.random.split(key, N_LAYERS)
        # f32 originals kept only for reference/validation.
        self.layers_f32 = tuple(_init_linear(keys[i], dims[i], dims[i + 1])
                                for i in range(N_LAYERS))
        w_pack, b_pack = _pack_model(self.layers_f32)

        # Canonical parameter storage: stacked (model, ...) tensors.
        # Index 0 = online, 1 = target (target starts as an exact copy,
        # mirroring target.load_state_dict(online.state_dict())).
        self.w_all = jnp.stack([w_pack, w_pack])   # (2, 5, 128, 128) bf16
        self.b_all = jnp.stack([b_pack, b_pack])   # (2, 8, 128) f32

        self.in_dim = input_dim
        self.out_dim = output_dim

    def sync_target(self):
        """target.load_state_dict(online.state_dict()) equivalent."""
        self.w_all = self.w_all.at[1].set(self.w_all[0])
        self.b_all = self.b_all.at[1].set(self.b_all[0])

    def forward_both(self, x):
        """One launch computing both models: returns (2, B, out_dim)."""
        midx = jnp.array([0, 1], jnp.int32)
        return _forward(x, midx, self.w_all, self.b_all, self.out_dim)

    def __call__(self, x, model):
        if model == 'online':
            midx = jnp.array([0], jnp.int32)
        elif model == 'target':
            midx = jnp.array([1], jnp.int32)
        else:
            raise ValueError(f"unknown model: {model}")
        return _forward(x, midx, self.w_all, self.b_all, self.out_dim)[0]


# --------------------------------------------------------------------------
# References for validation
# --------------------------------------------------------------------------
def _reference_packed(x, w_pack, b_pack, out_dim):
    """Plain-JAX reference using the same packed bf16-weight / f32-accum math."""
    in_dim = x.shape[1]
    h = jnp.pad(x, ((0, 0), (0, w_pack.shape[1] - in_dim)))
    for l in range(N_LAYERS):
        h = jnp.dot(h.astype(jnp.bfloat16), w_pack[l],
                    preferred_element_type=jnp.float32) + b_pack[l:l + 1, :]
        if l < N_LAYERS - 1:
            h = jnp.maximum(h, 0.0)
    return h[:, :out_dim]


def _reference_f32(x, layers):
    """True float32 reference (matches the PyTorch f32 nn.Linear math)."""
    h = x
    for i, (w, b) in enumerate(layers):
        h = jnp.dot(h, w) + b
        if i < len(layers) - 1:
            h = jnp.maximum(h, 0.0)
    return h


# --------------------------------------------------------------------------
# Self-test
# --------------------------------------------------------------------------
if __name__ == "__main__":
    key = jax.random.PRNGKey(0)
    k_param, k_input = jax.random.split(key)

    batch = 8
    input_dim = 32
    output_dim = 8

    net = NetPallas(input_dim, output_dim, k_param)
    x = jax.random.normal(k_input, (batch, input_dim), dtype=jnp.float32)

    out_online = jax.block_until_ready(net(x, 'online'))
    out_target = jax.block_until_ready(net(x, 'target'))
    out_both = jax.block_until_ready(net.forward_both(x))

    assert out_online.shape == (batch, output_dim)
    assert out_target.shape == (batch, output_dim)
    assert out_both.shape == (2, batch, output_dim)

    # Exact-math reference (same bf16-weight / f32-accum quantization).
    ref = _reference_packed(x, net.w_all[0], net.b_all[0], output_dim)
    assert jnp.allclose(out_online, ref, atol=1e-3, rtol=1e-3)

    # Looser check against the true-f32 PyTorch-style math (bf16 weight drift).
    ref32 = _reference_f32(x, net.layers_f32)
    assert jnp.allclose(out_online, ref32, atol=5e-2, rtol=5e-2)

    # target params are an exact copy of online -> identical outputs.
    assert jnp.allclose(out_online, out_target)
    assert jnp.allclose(out_both[0], out_online)
    assert jnp.allclose(out_both[1], out_target)

    # sync_target keeps target == online.
    net.sync_target()
    out_target2 = jax.block_until_ready(net(x, 'target'))
    assert jnp.allclose(out_target2, out_online)

    print("KERNEL_OK")
</pallas_src>

<mosaic_0001>
module attributes {stable_mosaic.version = 11 : i64} {
  func.func @_mlp_kernel(%arg0: i32, %arg1: memref<1xi32, #tpu.memory_space<smem>>, %arg2: memref<8x128xf32, #tpu.memory_space<vmem>>, %arg3: memref<1x5x128x128xbf16, #tpu.memory_space<vmem>>, %arg4: memref<1x8x128xf32, #tpu.memory_space<vmem>>, %arg5: memref<1x8x128xf32, #tpu.memory_space<vmem>>) attributes {dimension_semantics = [#tpu.dimension_semantics<parallel>], iteration_bounds = array<i64: 1>, scalar_prefetch = 1 : i64, scratch_operands = 0 : i64, tpu.core_type = #tpu.core_type<tc>, window_params = [{pipeline_mode = #tpu.pipeline_mode<synchronous>, transform_indices = @transform_0, window_bounds = array<i64: 8, 128>}, {transform_indices = @transform_1, window_bounds = array<i64: 1, 5, 128, 128>}, {transform_indices = @transform_2, window_bounds = array<i64: 1, 8, 128>}, {transform_indices = @transform_3, window_bounds = array<i64: 1, 8, 128>}]} {
    %c0 = arith.constant 0 : index
    %c0_0 = arith.constant 0 : index
    %0 = vector.load %arg2[%c0, %c0_0] : memref<8x128xf32, #tpu.memory_space<vmem>>, vector<8x128xf32>
    %c0_1 = arith.constant 0 : index
    %c0_2 = arith.constant 0 : index
    %c0_3 = arith.constant 0 : index
    %1 = vector.load %arg4[%c0_1, %c0_2, %c0_3] : memref<1x8x128xf32, #tpu.memory_space<vmem>>, vector<1x8x128xf32>
    %2 = vector.shape_cast %1 : vector<1x8x128xf32> to vector<8x128xf32>
    %c0_4 = arith.constant 0 : index
    %c0_5 = arith.constant 0 : index
    %c0_6 = arith.constant 0 : index
    %c0_7 = arith.constant 0 : index
    %3 = vector.load %arg3[%c0_4, %c0_5, %c0_6, %c0_7] : memref<1x5x128x128xbf16, #tpu.memory_space<vmem>>, vector<1x1x128x128xbf16>
    %4 = vector.shape_cast %3 : vector<1x1x128x128xbf16> to vector<128x128xbf16>
    %5 = arith.truncf %0 : vector<8x128xf32> to vector<8x128xbf16>
    %cst = arith.constant dense<0.000000e+00> : vector<8x128xf32>
    %6 = tpu.matmul %5, %4, %cst {dimension_numbers = #tpu.dot_dimension_numbers<[1], [0], [0], [1], [0, 0, 1, 1], [], []>} : vector<8x128xbf16>, vector<128x128xbf16>, vector<8x128xf32> -> vector<8x128xf32>
    %7 = vector.extract_strided_slice %2 {offsets = [0, 0], sizes = [1, 128], strides = [1, 1]} : vector<8x128xf32> to vector<1x128xf32>
    %8 = vector.broadcast %7 : vector<1x128xf32> to vector<8x128xf32>
    %9 = arith.addf %6, %8 : vector<8x128xf32>
    %cst_8 = arith.constant 0.000000e+00 : f32
    %10 = vector.broadcast %cst_8 : f32 to vector<8x128xf32>
    %11 = arith.maximumf %9, %10 : vector<8x128xf32>
    %c0_9 = arith.constant 0 : index
    %c1 = arith.constant 1 : index
    %c0_10 = arith.constant 0 : index
    %c0_11 = arith.constant 0 : index
    %12 = vector.load %arg3[%c0_9, %c1, %c0_10, %c0_11] : memref<1x5x128x128xbf16, #tpu.memory_space<vmem>>, vector<1x1x128x128xbf16>
    %13 = vector.shape_cast %12 : vector<1x1x128x128xbf16> to vector<128x128xbf16>
    %14 = arith.truncf %11 : vector<8x128xf32> to vector<8x128xbf16>
    %cst_12 = arith.constant dense<0.000000e+00> : vector<8x128xf32>
    %15 = tpu.matmul %14, %13, %cst_12 {dimension_numbers = #tpu.dot_dimension_numbers<[1], [0], [0], [1], [0, 0, 1, 1], [], []>} : vector<8x128xbf16>, vector<128x128xbf16>, vector<8x128xf32> -> vector<8x128xf32>
    %16 = vector.extract_strided_slice %2 {offsets = [1, 0], sizes = [1, 128], strides = [1, 1]} : vector<8x128xf32> to vector<1x128xf32>
    %17 = vector.broadcast %16 : vector<1x128xf32> to vector<8x128xf32>
    %18 = arith.addf %15, %17 : vector<8x128xf32>
    %cst_13 = arith.constant 0.000000e+00 : f32
    %19 = vector.broadcast %cst_13 : f32 to vector<8x128xf32>
    %20 = arith.maximumf %18, %19 : vector<8x128xf32>
    %c0_14 = arith.constant 0 : index
    %c2 = arith.constant 2 : index
    %c0_15 = arith.constant 0 : index
    %c0_16 = arith.constant 0 : index
    %21 = vector.load %arg3[%c0_14, %c2, %c0_15, %c0_16] : memref<1x5x128x128xbf16, #tpu.memory_space<vmem>>, vector<1x1x128x128xbf16>
    %22 = vector.shape_cast %21 : vector<1x1x128x128xbf16> to vector<128x128xbf16>
    %23 = arith.truncf %20 : vector<8x128xf32> to vector<8x128xbf16>
    %cst_17 = arith.constant dense<0.000000e+00> : vector<8x128xf32>
    %24 = tpu.matmul %23, %22, %cst_17 {dimension_numbers = #tpu.dot_dimension_numbers<[1], [0], [0], [1], [0, 0, 1, 1], [], []>} : vector<8x128xbf16>, vector<128x128xbf16>, vector<8x128xf32> -> vector<8x128xf32>
    %25 = vector.extract_strided_slice %2 {offsets = [2, 0], sizes = [1, 128], strides = [1, 1]} : vector<8x128xf32> to vector<1x128xf32>
    %26 = vector.broadcast %25 : vector<1x128xf32> to vector<8x128xf32>
    %27 = arith.addf %24, %26 : vector<8x128xf32>
    %cst_18 = arith.constant 0.000000e+00 : f32
    %28 = vector.broadcast %cst_18 : f32 to vector<8x128xf32>
    %29 = arith.maximumf %27, %28 : vector<8x128xf32>
    %c0_19 = arith.constant 0 : index
    %c3 = arith.constant 3 : index
    %c0_20 = arith.constant 0 : index
    %c0_21 = arith.constant 0 : index
    %30 = vector.load %arg3[%c0_19, %c3, %c0_20, %c0_21] : memref<1x5x128x128xbf16, #tpu.memory_space<vmem>>, vector<1x1x128x128xbf16>
    %31 = vector.shape_cast %30 : vector<1x1x128x128xbf16> to vector<128x128xbf16>
    %32 = arith.truncf %29 : vector<8x128xf32> to vector<8x128xbf16>
    %cst_22 = arith.constant dense<0.000000e+00> : vector<8x128xf32>
    %33 = tpu.matmul %32, %31, %cst_22 {dimension_numbers = #tpu.dot_dimension_numbers<[1], [0], [0], [1], [0, 0, 1, 1], [], []>} : vector<8x128xbf16>, vector<128x128xbf16>, vector<8x128xf32> -> vector<8x128xf32>
    %34 = vector.extract_strided_slice %2 {offsets = [3, 0], sizes = [1, 128], strides = [1, 1]} : vector<8x128xf32> to vector<1x128xf32>
    %35 = vector.broadcast %34 : vector<1x128xf32> to vector<8x128xf32>
    %36 = arith.addf %33, %35 : vector<8x128xf32>
    %cst_23 = arith.constant 0.000000e+00 : f32
    %37 = vector.broadcast %cst_23 : f32 to vector<8x128xf32>
    %38 = arith.maximumf %36, %37 : vector<8x128xf32>
    %c0_24 = arith.constant 0 : index
    %c4 = arith.constant 4 : index
    %c0_25 = arith.constant 0 : index
    %c0_26 = arith.constant 0 : index
    %39 = vector.load %arg3[%c0_24, %c4, %c0_25, %c0_26] : memref<1x5x128x128xbf16, #tpu.memory_space<vmem>>, vector<1x1x128x128xbf16>
    %40 = vector.shape_cast %39 : vector<1x1x128x128xbf16> to vector<128x128xbf16>
    %41 = arith.truncf %38 : vector<8x128xf32> to vector<8x128xbf16>
    %cst_27 = arith.constant dense<0.000000e+00> : vector<8x128xf32>
    %42 = tpu.matmul %41, %40, %cst_27 {dimension_numbers = #tpu.dot_dimension_numbers<[1], [0], [0], [1], [0, 0, 1, 1], [], []>} : vector<8x128xbf16>, vector<128x128xbf16>, vector<8x128xf32> -> vector<8x128xf32>
    %43 = vector.extract_strided_slice %2 {offsets = [4, 0], sizes = [1, 128], strides = [1, 1]} : vector<8x128xf32> to vector<1x128xf32>
    %44 = vector.broadcast %43 : vector<1x128xf32> to vector<8x128xf32>
    %45 = arith.addf %42, %44 : vector<8x128xf32>
    %c0_28 = arith.constant 0 : index
    %c0_29 = arith.constant 0 : index
    %c0_30 = arith.constant 0 : index
    %46 = vector.load %arg5[%c0_28, %c0_29, %c0_30] : memref<1x8x128xf32, #tpu.memory_space<vmem>>, vector<1x8x128xf32>
    %47 = vector.shape_cast %46 : vector<1x8x128xf32> to vector<8x128xf32>
    %48 = vector.shape_cast %45 : vector<8x128xf32> to vector<1x8x128xf32>
    tpu.vector_store %arg5[%c0_28, %c0_29, %c0_30], %48 {strides = array<i32>} : memref<1x8x128xf32, #tpu.memory_space<vmem>>, vector<1x8x128xf32>,
    return
  }
  func.func @transform_0(%arg0: i32, %arg1: memref<1xi32, #tpu.memory_space<smem>>) -> (i32, i32) {
    %c0_i32 = arith.constant 0 : i32
    %c0_i32_0 = arith.constant 0 : i32
    %c0_i32_1 = arith.constant 0 : i32
    return %c0_i32, %c0_i32_0 : i32, i32
  }
  func.func @transform_1(%arg0: i32, %arg1: memref<1xi32, #tpu.memory_space<smem>>) -> (i32, i32, i32, i32) {
    %0 = arith.index_cast %arg0 : i32 to index
    %1 = memref.load %arg1[%0] : memref<1xi32, #tpu.memory_space<smem>>
    %c0_i32 = arith.constant 0 : i32
    %c0_i32_0 = arith.constant 0 : i32
    %c0_i32_1 = arith.constant 0 : i32
    %c0_i32_2 = arith.constant 0 : i32
    return %1, %c0_i32, %c0_i32_0, %c0_i32_1 : i32, i32, i32, i32
  }
  func.func @transform_2(%arg0: i32, %arg1: memref<1xi32, #tpu.memory_space<smem>>) -> (i32, i32, i32) {
    %0 = arith.index_cast %arg0 : i32 to index
    %1 = memref.load %arg1[%0] : memref<1xi32, #tpu.memory_space<smem>>
    %c0_i32 = arith.constant 0 : i32
    %c0_i32_0 = arith.constant 0 : i32
    %c0_i32_1 = arith.constant 0 : i32
    return %1, %c0_i32, %c0_i32_0 : i32, i32, i32
  }
  func.func @transform_3(%arg0: i32, %arg1: memref<1xi32, #tpu.memory_space<smem>>) -> (i32, i32, i32) {
    %c0_i32 = arith.constant 0 : i32
    %c0_i32_0 = arith.constant 0 : i32
    %c0_i32_1 = arith.constant 0 : i32
    return %arg0, %c0_i32, %c0_i32_0 : i32, i32, i32
  }
}

</mosaic_0001>

<bundles_post_ra>
// kernel: _forward.1
= control target key start
LH: loop header
LB: loop body
LE: loop exit
PB: predicated region body
PF: predicated region fallthrough
CT: control target
= control target key end

     0   :  { %10 = vsyncpa [#allocation5], 0  ;;  %s1048_s0 = inlined_call_operand.<no memory space> [shape: s32[1], index: 0, kind: input, shape index: {}]   ;;  %s1049_s1 = inlined_call_operand.vmem [shape: f32[8,128], index: 1, kind: input, shape index: {}]   ;;  %s1050_s2 = inlined_call_operand.hbm [shape: bf16[2,5,128,128], index: 2, kind: input, shape index: {}]   ;;  %s1051_s3 = inlined_call_operand.vmem [shape: f32[2,8,128], index: 3, kind: input, shape index: {}]   ;;  %s1052_s4 = inlined_call_operand.hbm [shape: f32[1,8,128], index: 4, kind: output, shape index: {}]  }
   0x1   :  { %11 = vsyncpa [#allocation6], 0  ;;  %s820_s17 = smul.u32 5120, %s1048_s0  ;;  %s917_s18 = smov [#allocation4]  }
   0x2   :  { %s23_s19 = sshll.u32 %s917_s18, 4  ;;  %s869_s26 = scalar_lea.hbm %s1050_s2, 10240  ;;  %s24_s19 = int_to_ptr.vmem [resolvable:$true] %s23_s19 }
   0x3   :  { %s22_s22 = scalar_lea.hbm %s1050_s2, %s820_s17 }
   0x4   :  { %s867_s23 = scalar_lea.hbm %s22_s22, 5120  ;;  %p870_p1 = scmp.lt.u32.totalorder %s22_s22, %s1050_s2 }
   0x5   :  { %p868_p0 = scmp.ne.s32.totalorder %s22_s22, %s867_s23  ;;  %p871_p2 = scmp.lt.u32.totalorder %s869_s26, %s867_s23 }
   0x6   :  { %p873_p4 = scmp.lt.u32.totalorder %s867_s23, %s22_s22 }
   0x7   :  { %p872_p3 = por %p871_p2, %p870_p1 }
   0x9   :  { %p874_p5 = por %p873_p4, %p872_p3 }
   0xb   :  { %p875_p6 = pnand %p874_p5, %p868_p0 }
   0xd   :  { %878 = shalt.err (!%p875_p6)
}
   0xe   :  { %s879_s29 = scalar_lea.vmem %s24_s19, 5120  ;;  %p884_p8 = scmp.lt.s32.totalorder %s24_s19, %s24_s19 }
   0xf   :  { %p880_p7 = scmp.ne.s32.totalorder %s24_s19, %s879_s29  ;;  %p885_p9 = scmp.lt.s32.totalorder %s879_s29, %s879_s29 }
  0x11   :  { %p886_p10 = por %p885_p9, %p884_p8 }
  0x13   :  { %p887_p11 = pnand %p886_p10, %p880_p7 }
  0x15   :  { %890 = shalt.err (!%p887_p11)
}
  0x16   :  { %s918_s30 = smov 64   ;;  %s919_s5 = smov 4  }
  0x17   :  { %29 = dma.hbm_to_vmem [thread:$0]  %s22_s22, 5120, %s24_s19, [#allocation5], %s918_s30, %s918_s30, %s919_s5  }
  0x18   :  { %913 = dma.done.wait [#allocation5], 5120  }
  0x19   :  { %914 = vsyncadd [#allocation5], 4294962176  ;;  %v920_v0 = vmov 0.0   ;;  %vm921_vm0 = vmmov 0   ;;  %v827_v1 = vld [vmem:[#allocation4] sm:$0xff]   ;;  %v828_v2 = vld [vmem:[#allocation4 + $0x8] sm:$0xff]   ;;  %v73_v25 = vlaneseq }
  0x1a   :  { %720 = vmatprep.subr.bf16.mxu0 %v920_v0  ;;  %736 = vmatprep.mubr.msk.bf16.mxu0 %vm921_vm0, %v920_v0  ;;  %v829_v3 = vld [vmem:[#allocation4 + $0x10] sm:$0xff]   ;;  %v835_v4 = vld [vmem:[#allocation4 + $0x40] sm:$0xff]   ;;  %v830_v5 = vld [vmem:[#allocation4 + $0x18] sm:$0xff]   ;;  %p48_p12 = scmp.lt.s32.totalorder %s1048_s0, 1 }
  0x1b   :  { %740 = vmatprep.subr.bf16.mxu1 %v920_v0  ;;  %756 = vmatprep.mubr.msk.bf16.mxu1 %vm921_vm0, %v920_v0  ;;  %v836_v6 = vld [vmem:[#allocation4 + $0x48] sm:$0xff]   ;;  %v831_v7 = vld [vmem:[#allocation4 + $0x20] sm:$0xff]   ;;  %v837_v8 = vld [vmem:[#allocation4 + $0x50] sm:$0xff]   ;;  %v999_v26 = vshrl.u32 %v73_v25, 7 }
  0x1c   :  { %721 = vmatpush3.bf16.msra.mxu0 %v827_v1  ;;  %741 = vmatpush3.bf16.msra.mxu1 %v835_v4  ;;  %v832_v9 = vld [vmem:[#allocation4 + $0x28] sm:$0xff]   ;;  %v838_v10 = vld [vmem:[#allocation4 + $0x58] sm:$0xff]   ;;  %v833_v11 = vld [vmem:[#allocation4 + $0x30] sm:$0xff]   ;;  %s1054_s0 = smov (!%p48_p12, %s1048_s0), 1 }
  0x1d   :  { %722 = vmatprep.subr.bf16.mxu0 %v920_v0  ;;  %742 = vmatprep.subr.bf16.mxu1 %v920_v0  ;;  %v839_v12 = vld [vmem:[#allocation4 + $0x60] sm:$0xff]   ;;  %v834_v13 = vld [vmem:[#allocation4 + $0x38] sm:$0xff]   ;;  %v840_v15 = vld [vmem:[#allocation4 + $0x68] sm:$0xff]   ;;  %s634_s10 = sshll.u32 %s1054_s0, 3  ;;  %v75_v27 = vsub.s32 0, %v999_v26  ;;  %v186_v45 = vsub.s32 1, %v999_v26 }
  0x1e   :  { %v54_v14 = vld [vmem:[%s1049_s1] sm:$0xff]  ;;  %v841_v17 = vld [vmem:[#allocation4 + $0x70] sm:$0xff]   ;;  %v842_v18 = vld [vmem:[#allocation4 + $0x78] sm:$0xff]   ;;  %s51_s13 = scalar_lea.vmem %s1051_s3, %s634_s10  ;;  %v297_v62 = vsub.s32 2, %v999_v26  ;;  %s922_s0 = smov [#allocation7]  }
  0x1f   :  { %v72_v16 = vpack.c.bf16 %v54_v14, %v54_v14  ;;  %v843_v19 = vld [vmem:[#allocation4 + $0x80] sm:$0xff]   ;;  %v844_v20 = vld [vmem:[#allocation4 + $0x88] sm:$0xff]   ;;  %v845_v21 = vld [vmem:[#allocation4 + $0x90] sm:$0xff]   ;;  %s616_s3 = sshll.u32 %s922_s0, 4  ;;  %s617_s3 = int_to_ptr.vmem [resolvable:$true] %s616_s3 }
  0x20   :  { %723 = vmatpush3.bf16.msra.mxu0 %v828_v2  ;;  %743 = vmatpush3.bf16.msra.mxu1 %v836_v6  ;;  %v846_v22 = vld [vmem:[#allocation4 + $0x98] sm:$0xff]   ;;  %v847_v23 = vld [vmem:[#allocation4 + $0xa0] sm:$0xff]   ;;  %v848_v24 = vld [vmem:[#allocation4 + $0xa8] sm:$0xff]   ;;  %s891_s14 = scalar_lea.vmem %s617_s3, 128  ;;  %p896_p0 = scmp.lt.s32.totalorder %s617_s3, %s617_s3 }
  0x21   :  { %724 = vmatprep.subr.bf16.mxu0 %v920_v0  ;;  %744 = vmatprep.subr.bf16.mxu1 %v920_v0  ;;  %v1005_v28 = vld [vmem:[%s51_s13] sm:$0xff]  ;;  %v849_v37 = vld [vmem:[#allocation4 + $0xb0] sm:$0xff]   ;;  %v850_v38 = vld [vmem:[#allocation4 + $0xb8] sm:$0xff]   ;;  %p892_p13 = scmp.ne.s32.totalorder %s617_s3, %s891_s14  ;;  %p897_p1 = scmp.lt.s32.totalorder %s891_s14, %s891_s14 }
  0x22   :  { %v76_v29 = vrot.slane %v1005_v28, %v75_v27  ;;  %v851_v39 = vld [vmem:[#allocation4 + $0xc0] sm:$0xff]   ;;  %v852_v40 = vld [vmem:[#allocation4 + $0xc8] sm:$0xff]   ;;  %v853_v41 = vld [vmem:[#allocation4 + $0xd0] sm:$0xff]   ;;  %v187_v46 = vrot.slane %v1005_v28, %v186_v45  ;;  %v298_v63 = vrot.slane %v1005_v28, %v297_v62 }
  0x23   :  { %v854_v42 = vld [vmem:[#allocation4 + $0xd8] sm:$0xff]   ;;  %v855_v43 = vld [vmem:[#allocation4 + $0xe0] sm:$0xff]   ;;  %v856_v44 = vld [vmem:[#allocation4 + $0xe8] sm:$0xff]   ;;  %p898_p2 = por %p897_p1, %p896_p0 }
  0x24   :  { %725 = vmatpush3.bf16.msra.mxu0 %v829_v3  ;;  %745 = vmatpush3.bf16.msra.mxu1 %v837_v8  ;;  %v857_v54 = vld [vmem:[#allocation4 + $0xf0] sm:$0xff]   ;;  %v858_v55 = vld [vmem:[#allocation4 + $0xf8] sm:$0xff]   ;;  %v859_v56 = vld [vmem:[#allocation4 + $0x100] sm:$0xff]  }
  0x25   :  { %726 = vmatprep.subr.bf16.mxu0 %v920_v0  ;;  %746 = vmatprep.subr.bf16.mxu1 %v920_v0  ;;  %v860_v57 = vld [vmem:[#allocation4 + $0x108] sm:$0xff]   ;;  %v861_v58 = vld [vmem:[#allocation4 + $0x110] sm:$0xff]   ;;  %v862_v59 = vld [vmem:[#allocation4 + $0x118] sm:$0xff]   ;;  %p899_p3 = pnand %p898_p2, %p892_p13 }
  0x26   :  { %v863_v60 = vld [vmem:[#allocation4 + $0x120] sm:$0xff]   ;;  %v864_v61 = vld [vmem:[#allocation4 + $0x128] sm:$0xff]   ;;  %v865_v8 = vld [vmem:[#allocation4 + $0x130] sm:$0xff]  }
  0x28   :  { %727 = vmatpush3.bf16.msra.mxu0 %v830_v5  ;;  %747 = vmatpush3.bf16.msra.mxu1 %v838_v10  ;;  %v408_v10 = vsub.s32 3, %v999_v26 }
  0x29   :  { %728 = vmatprep.subr.bf16.mxu0 %v920_v0  ;;  %748 = vmatprep.subr.bf16.mxu1 %v920_v0 }
  0x2c   :  { %729 = vmatpush3.bf16.msra.mxu0 %v831_v7  ;;  %749 = vmatpush3.bf16.msra.mxu1 %v839_v12 }
  0x2d   :  { %730 = vmatprep.subr.bf16.mxu0 %v920_v0  ;;  %750 = vmatprep.subr.bf16.mxu1 %v920_v0 }
  0x30   :  { %731 = vmatpush3.bf16.msra.mxu0 %v832_v9  ;;  %751 = vmatpush3.bf16.msra.mxu1 %v840_v15  ;;  %v866_v9 = vld [vmem:[#allocation4 + $0x138] sm:$0xff]  }
  0x31   :  { %732 = vmatprep.subr.bf16.mxu0 %v920_v0  ;;  %752 = vmatprep.subr.bf16.mxu1 %v920_v0 }
  0x34   :  { %733 = vmatpush3.bf16.msra.mxu0 %v833_v11  ;;  %753 = vmatpush3.bf16.msra.mxu1 %v841_v17  ;;  %v409_v11 = vrot.slane %v1005_v28, %v408_v10 }
  0x35   :  { %734 = vmatprep.subr.bf16.mxu0 %v920_v0  ;;  %754 = vmatprep.subr.bf16.mxu1 %v920_v0 }
  0x38   :  { %735 = vmatpush3.bf16.msra.mxu0 %v834_v13  ;;  %755 = vmatpush3.bf16.msra.mxu1 %v842_v18 }
  0x39   :  { %760 = vmatprep.subr.bf16.mxu0 %v920_v0  ;;  %780 = vmatprep.subr.bf16.mxu1 %v920_v0 }
  0x3b   :  { %737 = vmatmul.mubr.bf16.vlgmr.msra.gmra.mrb[0].mxu0 %v72_v16 }
  0x3c   :  { %776 = vmatprep.mubr.msk.bf16.mxu0 %vm921_vm0, %v920_v0  ;;  %761 = vmatpush3.bf16.msra.mxu0 %v843_v19  ;;  %v519_v19 = vsub.s32 4, %v999_v26 }
  0x3d   :  { %762 = vmatprep.subr.bf16.mxu0 %v920_v0 }
  0x40   :  { %763 = vmatpush3.bf16.msra.mxu0 %v844_v20  ;;  %v520_v20 = vrot.slane %v1005_v28, %v519_v19 }
  0x41   :  { %764 = vmatprep.subr.bf16.mxu0 %v920_v0 }
  0x44   :  { %765 = vmatpush3.bf16.msra.mxu0 %v845_v21 }
  0x45   :  { %766 = vmatprep.subr.bf16.mxu0 %v920_v0 }
  0x48   :  { %767 = vmatpush3.bf16.msra.mxu0 %v846_v22 }
  0x49   :  { %768 = vmatprep.subr.bf16.mxu0 %v920_v0 }
  0x4c   :  { %769 = vmatpush3.bf16.msra.mxu0 %v847_v23 }
  0x4d   :  { %770 = vmatprep.subr.bf16.mxu0 %v920_v0 }
  0x50   :  { %771 = vmatpush3.bf16.msra.mxu0 %v848_v24 }
  0x51   :  { %772 = vmatprep.subr.bf16.mxu0 %v920_v0 }
  0x54   :  { %773 = vmatpush3.bf16.msra.mxu0 %v849_v37 }
  0x55   :  { %774 = vmatprep.subr.bf16.mxu0 %v920_v0 }
  0x58   :  { %775 = vmatpush3.bf16.msra.mxu0 %v850_v38 }
  0x59   :  { %800 = vmatprep.subr.bf16.mxu0 %v920_v0 }
 0x10e   :  { %v159_v30 = vpop.f32.mrb[0].mxu0 }
 0x10f   :  { %v160_v31 = vadd.f32 %v159_v30, %v76_v29  ;;  %v738_v32 = vpop.f32.mrb[1].mxu0 }
 0x110   :  { %v162_v33 = vpop.f32.mrb[2].mxu0 }
 0x111   :  { %v165_v34 = vmax.f32 %v160_v31, 0.0  ;;  %v739_v35 = vpop.f32.mrb[3].mxu0 }
 0x113   :  { %v183_v36 = vpack.c.bf16 %v165_v34, %v165_v34 }
 0x115   :  { %757 = vmatmul.mubr.bf16.vlgmr.msra.gmra.mrb[0].mxu1 %v183_v36 }
 0x116   :  { %796 = vmatprep.mubr.msk.bf16.mxu1 %vm921_vm0, %v920_v0  ;;  %781 = vmatpush3.bf16.msra.mxu1 %v851_v39 }
 0x117   :  { %782 = vmatprep.subr.bf16.mxu1 %v920_v0 }
 0x11a   :  { %783 = vmatpush3.bf16.msra.mxu1 %v852_v40 }
 0x11b   :  { %784 = vmatprep.subr.bf16.mxu1 %v920_v0 }
 0x11e   :  { %785 = vmatpush3.bf16.msra.mxu1 %v853_v41 }
 0x11f   :  { %786 = vmatprep.subr.bf16.mxu1 %v920_v0 }
 0x122   :  { %787 = vmatpush3.bf16.msra.mxu1 %v854_v42 }
 0x123   :  { %788 = vmatprep.subr.bf16.mxu1 %v920_v0 }
 0x126   :  { %789 = vmatpush3.bf16.msra.mxu1 %v855_v43 }
 0x127   :  { %790 = vmatprep.subr.bf16.mxu1 %v920_v0 }
 0x12a   :  { %791 = vmatpush3.bf16.msra.mxu1 %v856_v44 }
 0x12b   :  { %792 = vmatprep.subr.bf16.mxu1 %v920_v0 }
 0x12e   :  { %793 = vmatpush3.bf16.msra.mxu1 %v857_v54 }
 0x12f   :  { %794 = vmatprep.subr.bf16.mxu1 %v920_v0 }
 0x132   :  { %795 = vmatpush3.bf16.msra.mxu1 %v858_v55 }
 0x1e8   :  { %v270_v47 = vpop.f32.mrb[0].mxu1 }
 0x1e9   :  { %v271_v48 = vadd.f32 %v270_v47, %v187_v46  ;;  %v758_v49 = vpop.f32.mrb[1].mxu1 }
 0x1ea   :  { %v273_v50 = vpop.f32.mrb[2].mxu1 }
 0x1eb   :  { %v276_v51 = vmax.f32 %v271_v48, 0.0  ;;  %v759_v52 = vpop.f32.mrb[3].mxu1 }
 0x1ed   :  { %v294_v53 = vpack.c.bf16 %v276_v51, %v276_v51 }
 0x1ef   :  { %777 = vmatmul.mubr.bf16.vlgmr.msra.gmra.mrb[4].mxu0 %v294_v53 }
 0x1f0   :  { %816 = vmatprep.mubr.msk.bf16.mxu0 %vm921_vm0, %v920_v0  ;;  %801 = vmatpush3.bf16.msra.mxu0 %v859_v56 }
 0x1f1   :  { %802 = vmatprep.subr.bf16.mxu0 %v920_v0 }
 0x1f4   :  { %803 = vmatpush3.bf16.msra.mxu0 %v860_v57 }
 0x1f5   :  { %804 = vmatprep.subr.bf16.mxu0 %v920_v0 }
 0x1f8   :  { %805 = vmatpush3.bf16.msra.mxu0 %v861_v58 }
 0x1f9   :  { %806 = vmatprep.subr.bf16.mxu0 %v920_v0 }
 0x1fc   :  { %807 = vmatpush3.bf16.msra.mxu0 %v862_v59 }
 0x1fd   :  { %808 = vmatprep.subr.bf16.mxu0 %v920_v0 }
 0x200   :  { %809 = vmatpush3.bf16.msra.mxu0 %v863_v60 }
 0x201   :  { %810 = vmatprep.subr.bf16.mxu0 %v920_v0 }
 0x204   :  { %811 = vmatpush3.bf16.msra.mxu0 %v864_v61 }
 0x205   :  { %812 = vmatprep.subr.bf16.mxu0 %v920_v0 }
 0x208   :  { %813 = vmatpush3.bf16.msra.mxu0 %v865_v8 }
 0x209   :  { %814 = vmatprep.subr.bf16.mxu0 %v920_v0 }
 0x20c   :  { %815 = vmatpush3.bf16.msra.mxu0 %v866_v9 }
 0x2c2   :  { %v381_v1 = vpop.f32.mrb[4].mxu0 }
 0x2c3   :  { %v382_v2 = vadd.f32 %v381_v1, %v298_v63  ;;  %v778_v3 = vpop.f32.mrb[5].mxu0 }
 0x2c4   :  { %v384_v4 = vpop.f32.mrb[6].mxu0 }
 0x2c5   :  { %v387_v5 = vmax.f32 %v382_v2, 0.0  ;;  %v779_v6 = vpop.f32.mrb[7].mxu0 }
 0x2c7   :  { %v405_v7 = vpack.c.bf16 %v387_v5, %v387_v5 }
 0x2c9   :  { %797 = vmatmul.mubr.bf16.vlgmr.msra.gmra.mrb[4].mxu1 %v405_v7 }
 0x39c   :  { %v492_v12 = vpop.f32.mrb[4].mxu1 }
 0x39d   :  { %v493_v13 = vadd.f32 %v492_v12, %v409_v11  ;;  %v798_v14 = vpop.f32.mrb[5].mxu1 }
 0x39e   :  { %v495_v15 = vpop.f32.mrb[6].mxu1 }
 0x39f   :  { %v498_v16 = vmax.f32 %v493_v13, 0.0  ;;  %v799_v17 = vpop.f32.mrb[7].mxu1 }
 0x3a1   :  { %v516_v18 = vpack.c.bf16 %v498_v16, %v498_v16 }
 0x3a3   :  { %817 = vmatmul.mubr.bf16.vlgmr.msra.gmra.mrb[8].mxu0 %v516_v18 }
 0x476   :  { %v603_v0 = vpop.f32.mrb[8].mxu0 }
 0x477   :  { %v604_v21 = vadd.f32 %v603_v0, %v520_v20  ;;  %v818_v22 = vpop.f32.mrb[9].mxu0 }
 0x478   :  { %v606_v23 = vpop.f32.mrb[10].mxu0 }
 0x479   :  { %609 = vst [vmem:[#allocation7] sm:$0xff] %v604_v21  ;;  %v819_v24 = vpop.f32.mrb[11].mxu0 }
 0x47a   :  { %902 = shalt.err (!%p899_p3)
}
 0x47b   :  { %s903_s17 = scalar_lea.hbm %s1052_s4, 128 }
 0x47c   :  { %p904_p4 = scmp.ne.s32.totalorder %s1052_s4, %s903_s17  ;;  %p907_p5 = scmp.lt.u32.totalorder %s903_s17, %s1052_s4 }
 0x47e   :  { %p909_p6 = pnand %p907_p5, %p904_p4 }
 0x480   :  { %912 = shalt.err (!%p909_p6)
}
 0x481   :  { %619 = dma.vmem_to_hbm [thread:$0]  %s617_s3, 128, %s1052_s4, [#allocation6]  }
 0x482   :  { %915 = dma.done.wait [#allocation6], 128  }
 0x483   :  { %916 = vsyncadd [#allocation6], 4294967168 }
 0x484   :  { %623 = vsyncpa [#allocation5], 1 }
 0x485   :  { %624 = vsyncpa [#allocation6], 1 }

</bundles_post_ra>
